<compile_context>
chip_gen: v5e
topology: v5e:2x2
jax: 0.10.0
libtpu: 0.0.40
codegen_flags: <defaults>
</compile_context>

<pallas_src>
import functools
import math

import jax
import jax.numpy as jnp
from jax.experimental import pallas as pl
from jax.experimental.pallas import tpu as pltpu

IN_F, H1_F, H2_F, OUT_F = 20, 64, 32, 16


def _round_up(x, m):
    return ((x + m - 1) // m) * m


def nest_mlp_kernel(x_ref, w1_ref, b1_ref, w2_ref, b2_ref, w3_ref, b3_ref,
                    o_ref, *, mxu_dtype, ew_dtype):
    # Weights / h1,h2 biases arrive pre-cast from the wrapper (no per-step
    # VALU casts on VMEM-resident operands).  x is cast per streamed tile.
    x = x_ref[...].astype(mxu_dtype)                                  # (TB, 20)

    # net[0]: Linear(20, 64) + ReLU
    h1 = jnp.dot(x, w1_ref[...], preferred_element_type=jnp.float32)
    h1 = jnp.maximum(h1.astype(ew_dtype) + b1_ref[...], 0).astype(mxu_dtype)

    # net[2]: Linear(64, 32) + ReLU
    h2 = jnp.dot(h1, w2_ref[...], preferred_element_type=jnp.float32)
    h2 = jnp.maximum(h2.astype(ew_dtype) + b2_ref[...], 0).astype(mxu_dtype)

    # self.linear: Linear(32, 16)  (final bias-add kept in f32)
    out = jnp.dot(h2, w3_ref[...], preferred_element_type=jnp.float32)
    o_ref[...] = (out + b3_ref[...]).astype(o_ref.dtype)


def _default_elementwise_dtype():
    """bf16 elementwise on v6e/v7x (native bf16 VPU); f32 on v5 (no bf16 VPU)."""
    try:
        kind = jax.devices()[0].device_kind.lower()
    except Exception:
        return jnp.float32
    return jnp.float32 if "v5" in kind else jnp.bfloat16


def _choose_tile_b(B, cap):
    cap = _round_up(max(cap, 8), 8)
    if B >= 2048:
        # Guarantee >=2 grid steps so the "parallel" batch axis can shard
        # across both v7x TensorCores; harmless (still >=1024-row tiles) on
        # single-TC generations.
        return min(cap, _round_up(-(-B // 2), 8))
    # Small/moderate batch: one grid step, zero pipelining overhead.
    return min(cap, _round_up(max(B, 8), 8))


def nest_mlp(x, params, *, tile_b=4096, mxu_dtype=jnp.bfloat16, ew_dtype=None):
    """Fused MLP forward.  x: (B, 20) f32 -> (B, 16) f32."""
    w1, b1, w2, b2, w3, b3 = params
    B = x.shape[0]

    if ew_dtype is None:
        ew_dtype = (jnp.float32 if mxu_dtype == jnp.float32
                    else _default_elementwise_dtype())

    # Hoist casts out of the kernel body: weights to the MXU dtype, h1/h2
    # biases to the elementwise dtype.  b3 stays f32 (final f32 add).
    w1, w2, w3 = (w.astype(mxu_dtype) for w in (w1, w2, w3))
    b1, b2 = b1.astype(ew_dtype), b2.astype(ew_dtype)

    tb = _choose_tile_b(B, tile_b)
    grid = (pl.cdiv(B, tb),)

    const2 = lambda i: (0, 0)   # weights/biases: fetched once, VMEM-resident

    kernel = functools.partial(nest_mlp_kernel,
                               mxu_dtype=mxu_dtype, ew_dtype=ew_dtype)

    flops = 2 * B * (IN_F * H1_F + H1_F * H2_F + H2_F * OUT_F)
    bytes_accessed = int(
        B * (IN_F + OUT_F) * 4
        + sum(int(a.size) * a.dtype.itemsize for a in (w1, b1, w2, b2, w3, b3)))

    return pl.pallas_call(
        kernel,
        out_shape=jax.ShapeDtypeStruct((B, OUT_F), jnp.float32),
        grid=grid,
        in_specs=[
            pl.BlockSpec((tb, IN_F), lambda i: (i, 0)),   # x tile, streamed
            pl.BlockSpec((IN_F, H1_F), const2),           # w1
            pl.BlockSpec((1, H1_F), const2),              # b1
            pl.BlockSpec((H1_F, H2_F), const2),           # w2
            pl.BlockSpec((1, H2_F), const2),              # b2
            pl.BlockSpec((H2_F, OUT_F), const2),          # w3
            pl.BlockSpec((1, OUT_F), const2),             # b3
        ],
        out_specs=pl.BlockSpec((tb, OUT_F), lambda i: (i, 0)),
        compiler_params=pltpu.CompilerParams(
            dimension_semantics=("parallel",),             # megacore on v7x
            vmem_limit_bytes=32 * 1024 * 1024,             # <= half v7x physical
        ),
        cost_estimate=pl.CostEstimate(
            flops=flops, transcendentals=0, bytes_accessed=bytes_accessed),
    )(x, w1, b1, w2, b2, w3, b3)


def init_params(key):
    """Deterministic init mirroring PyTorch nn.Linear default
    (uniform(-1/sqrt(fan_in), 1/sqrt(fan_in))).  Weights stored (in, out)."""
    def linear(key, fan_in, fan_out):
        kw, kb = jax.random.split(key)
        bound = 1.0 / math.sqrt(fan_in)
        w = jax.random.uniform(kw, (fan_in, fan_out), jnp.float32, -bound, bound)
        b = jax.random.uniform(kb, (1, fan_out), jnp.float32, -bound, bound)
        return w, b

    k1, k2, k3 = jax.random.split(key, 3)
    w1, b1 = linear(k1, IN_F, H1_F)
    w2, b2 = linear(k2, H1_F, H2_F)
    w3, b3 = linear(k3, H2_F, OUT_F)
    return w1, b1, w2, b2, w3, b3


def nest_mlp_ref(x, params, mxu_dtype=jnp.float32, ew_dtype=jnp.float32):
    """Plain-JAX reference; dtype args mirror the kernel's cast points exactly."""
    w1, b1, w2, b2, w3, b3 = params
    w1, w2, w3 = (w.astype(mxu_dtype) for w in (w1, w2, w3))
    b1e, b2e = b1.astype(ew_dtype), b2.astype(ew_dtype)

    def mm(a, w):
        return jnp.dot(a.astype(mxu_dtype), w, preferred_element_type=jnp.float32)

    h1 = jnp.maximum(mm(x, w1).astype(ew_dtype) + b1e, 0).astype(mxu_dtype)
    h2 = jnp.maximum(mm(h1, w2).astype(ew_dtype) + b2e, 0).astype(mxu_dtype)
    return mm(h2, w3) + b3


if __name__ == "__main__":
    key = jax.random.PRNGKey(0)
    kx, kp = jax.random.split(key)

    B = 8
    x = jax.random.normal(kx, (B, IN_F), jnp.float32)
    params = init_params(kp)

    out = jax.block_until_ready(nest_mlp(x, params))
    assert out.shape == (B, OUT_F), out.shape

    # Tight check vs a reference that mirrors the kernel's exact dtype path.
    ew = _default_elementwise_dtype()
    ref_match = nest_mlp_ref(x, params, mxu_dtype=jnp.bfloat16, ew_dtype=ew)
    assert jnp.allclose(out, ref_match, atol=1e-3, rtol=1e-3), \
        "mismatch vs dtype-matched reference"

    # Loose sanity check vs the full-f32 reference (bf16 rounding only).
    ref_f32 = nest_mlp_ref(x, params)
    assert jnp.allclose(out, ref_f32, atol=7.5e-2, rtol=7.5e-2), \
        "mismatch vs f32 reference"

    print("KERNEL_OK")
</pallas_src>

<mosaic_0001>
module attributes {stable_mosaic.version = 11 : i64} {
  func.func @nest_mlp_kernel(%arg0: i32, %arg1: memref<8x20xf32, #tpu.memory_space<vmem>>, %arg2: memref<20x64xbf16, #tpu.memory_space<vmem>>, %arg3: memref<1x64xbf16, #tpu.memory_space<vmem>>, %arg4: memref<64x32xbf16, #tpu.memory_space<vmem>>, %arg5: memref<1x32xbf16, #tpu.memory_space<vmem>>, %arg6: memref<32x16xbf16, #tpu.memory_space<vmem>>, %arg7: memref<1x16xf32, #tpu.memory_space<vmem>>, %arg8: memref<8x16xf32, #tpu.memory_space<vmem>>) attributes {dimension_semantics = [#tpu.dimension_semantics<parallel>], iteration_bounds = array<i64: 1>, scalar_prefetch = 0 : i64, scratch_operands = 0 : i64, tpu.core_type = #tpu.core_type<tc>, window_params = [{transform_indices = @transform_0, window_bounds = array<i64: 8, 20>}, {pipeline_mode = #tpu.pipeline_mode<synchronous>, transform_indices = @transform_1, window_bounds = array<i64: 20, 64>}, {pipeline_mode = #tpu.pipeline_mode<synchronous>, transform_indices = @transform_2, window_bounds = array<i64: 1, 64>}, {pipeline_mode = #tpu.pipeline_mode<synchronous>, transform_indices = @transform_3, window_bounds = array<i64: 64, 32>}, {pipeline_mode = #tpu.pipeline_mode<synchronous>, transform_indices = @transform_4, window_bounds = array<i64: 1, 32>}, {pipeline_mode = #tpu.pipeline_mode<synchronous>, transform_indices = @transform_5, window_bounds = array<i64: 32, 16>}, {pipeline_mode = #tpu.pipeline_mode<synchronous>, transform_indices = @transform_6, window_bounds = array<i64: 1, 16>}, {transform_indices = @transform_7, window_bounds = array<i64: 8, 16>}]} {
    %c0 = arith.constant 0 : index
    %c0_0 = arith.constant 0 : index
    %0 = vector.load %arg1[%c0, %c0_0] : memref<8x20xf32, #tpu.memory_space<vmem>>, vector<8x20xf32>
    %1 = arith.truncf %0 : vector<8x20xf32> to vector<8x20xbf16>
    %c0_1 = arith.constant 0 : index
    %c0_2 = arith.constant 0 : index
    %2 = vector.load %arg2[%c0_1, %c0_2] : memref<20x64xbf16, #tpu.memory_space<vmem>>, vector<20x64xbf16>
    %cst = arith.constant dense<0.000000e+00> : vector<8x64xf32>
    %3 = tpu.matmul %1, %2, %cst {dimension_numbers = #tpu.dot_dimension_numbers<[1], [0], [0], [1], [0, 0, 1, 1], [], []>} : vector<8x20xbf16>, vector<20x64xbf16>, vector<8x64xf32> -> vector<8x64xf32>
    %4 = arith.truncf %3 : vector<8x64xf32> to vector<8x64xbf16>
    %c0_3 = arith.constant 0 : index
    %c0_4 = arith.constant 0 : index
    %5 = vector.load %arg3[%c0_3, %c0_4] : memref<1x64xbf16, #tpu.memory_space<vmem>>, vector<1x64xbf16>
    %6 = vector.broadcast %5 : vector<1x64xbf16> to vector<8x64xbf16>
    %7 = arith.addf %4, %6 : vector<8x64xbf16>
    %cst_5 = arith.constant 0.000000e+00 : bf16
    %8 = vector.broadcast %cst_5 : bf16 to vector<8x64xbf16>
    %9 = arith.maximumf %7, %8 : vector<8x64xbf16>
    %c0_6 = arith.constant 0 : index
    %c0_7 = arith.constant 0 : index
    %10 = vector.load %arg4[%c0_6, %c0_7] : memref<64x32xbf16, #tpu.memory_space<vmem>>, vector<64x32xbf16>
    %cst_8 = arith.constant dense<0.000000e+00> : vector<8x32xf32>
    %11 = tpu.matmul %9, %10, %cst_8 {dimension_numbers = #tpu.dot_dimension_numbers<[1], [0], [0], [1], [0, 0, 1, 1], [], []>} : vector<8x64xbf16>, vector<64x32xbf16>, vector<8x32xf32> -> vector<8x32xf32>
    %12 = arith.truncf %11 : vector<8x32xf32> to vector<8x32xbf16>
    %c0_9 = arith.constant 0 : index
    %c0_10 = arith.constant 0 : index
    %13 = vector.load %arg5[%c0_9, %c0_10] : memref<1x32xbf16, #tpu.memory_space<vmem>>, vector<1x32xbf16>
    %14 = vector.broadcast %13 : vector<1x32xbf16> to vector<8x32xbf16>
    %15 = arith.addf %12, %14 : vector<8x32xbf16>
    %cst_11 = arith.constant 0.000000e+00 : bf16
    %16 = vector.broadcast %cst_11 : bf16 to vector<8x32xbf16>
    %17 = arith.maximumf %15, %16 : vector<8x32xbf16>
    %c0_12 = arith.constant 0 : index
    %c0_13 = arith.constant 0 : index
    %18 = vector.load %arg6[%c0_12, %c0_13] : memref<32x16xbf16, #tpu.memory_space<vmem>>, vector<32x16xbf16>
    %cst_14 = arith.constant dense<0.000000e+00> : vector<8x16xf32>
    %19 = tpu.matmul %17, %18, %cst_14 {dimension_numbers = #tpu.dot_dimension_numbers<[1], [0], [0], [1], [0, 0, 1, 1], [], []>} : vector<8x32xbf16>, vector<32x16xbf16>, vector<8x16xf32> -> vector<8x16xf32>
    %c0_15 = arith.constant 0 : index
    %c0_16 = arith.constant 0 : index
    %20 = vector.load %arg7[%c0_15, %c0_16] : memref<1x16xf32, #tpu.memory_space<vmem>>, vector<1x16xf32>
    %21 = vector.broadcast %20 : vector<1x16xf32> to vector<8x16xf32>
    %22 = arith.addf %19, %21 : vector<8x16xf32>
    %c0_17 = arith.constant 0 : index
    %c0_18 = arith.constant 0 : index
    %23 = vector.load %arg8[%c0_17, %c0_18] : memref<8x16xf32, #tpu.memory_space<vmem>>, vector<8x16xf32>
    tpu.vector_store %arg8[%c0_17, %c0_18], %22 {strides = array<i32>} : memref<8x16xf32, #tpu.memory_space<vmem>>, vector<8x16xf32>,
    return
  }
  func.func @transform_0(%arg0: i32) -> (i32, i32) {
    %c0_i32 = arith.constant 0 : i32
    %c0_i32_0 = arith.constant 0 : i32
    return %arg0, %c0_i32 : i32, i32
  }
  func.func @transform_1(%arg0: i32) -> (i32, i32) {
    %c0_i32 = arith.constant 0 : i32
    %c0_i32_0 = arith.constant 0 : i32
    %c0_i32_1 = arith.constant 0 : i32
    return %c0_i32, %c0_i32_0 : i32, i32
  }
  func.func @transform_2(%arg0: i32) -> (i32, i32) {
    %c0_i32 = arith.constant 0 : i32
    %c0_i32_0 = arith.constant 0 : i32
    %c0_i32_1 = arith.constant 0 : i32
    return %c0_i32, %c0_i32_0 : i32, i32
  }
  func.func @transform_3(%arg0: i32) -> (i32, i32) {
    %c0_i32 = arith.constant 0 : i32
    %c0_i32_0 = arith.constant 0 : i32
    %c0_i32_1 = arith.constant 0 : i32
    return %c0_i32, %c0_i32_0 : i32, i32
  }
  func.func @transform_4(%arg0: i32) -> (i32, i32) {
    %c0_i32 = arith.constant 0 : i32
    %c0_i32_0 = arith.constant 0 : i32
    %c0_i32_1 = arith.constant 0 : i32
    return %c0_i32, %c0_i32_0 : i32, i32
  }
  func.func @transform_5(%arg0: i32) -> (i32, i32) {
    %c0_i32 = arith.constant 0 : i32
    %c0_i32_0 = arith.constant 0 : i32
    %c0_i32_1 = arith.constant 0 : i32
    return %c0_i32, %c0_i32_0 : i32, i32
  }
  func.func @transform_6(%arg0: i32) -> (i32, i32) {
    %c0_i32 = arith.constant 0 : i32
    %c0_i32_0 = arith.constant 0 : i32
    %c0_i32_1 = arith.constant 0 : i32
    return %c0_i32, %c0_i32_0 : i32, i32
  }
  func.func @transform_7(%arg0: i32) -> (i32, i32) {
    %c0_i32 = arith.constant 0 : i32
    %c0_i32_0 = arith.constant 0 : i32
    return %arg0, %c0_i32 : i32, i32
  }
}

</mosaic_0001>

<bundles_post_ra>
// kernel: tpu_custom_call.1
= control target key start
LH: loop header
LB: loop body
LE: loop exit
PB: predicated region body
PF: predicated region fallthrough
CT: control target
= control target key end

     0   :  { %s339_s0 = inlined_call_operand.vmem [shape: f32[8,20], index: 0, kind: input, shape index: {}]   ;;  %s340_s1 = inlined_call_operand.vmem [shape: bf16[20,64], index: 1, kind: input, shape index: {}]   ;;  %s341_s2 = inlined_call_operand.vmem [shape: bf16[1,64], index: 2, kind: input, shape index: {}]   ;;  %s342_s3 = inlined_call_operand.vmem [shape: bf16[64,32], index: 3, kind: input, shape index: {}]   ;;  %s343_s4 = inlined_call_operand.vmem [shape: bf16[1,32], index: 4, kind: input, shape index: {}]   ;;  %s344_s5 = inlined_call_operand.vmem [shape: bf16[32,16], index: 5, kind: input, shape index: {}]   ;;  %s345_s6 = inlined_call_operand.vmem [shape: f32[1,16], index: 6, kind: input, shape index: {}]   ;;  %s346_s7 = inlined_call_operand.hbm [shape: f32[8,16], index: 7, kind: output, shape index: {}]  }
   0x1   :  { %v32_v0 = vld [vmem:[%s340_s1 + $0x8] sm:$0x3]  ;;  %v228_v2 = vld [vmem:[%s342_s3 + $0x18] sm:$0xff] }
   0x2   :  { %v38_v1 = vunpack.c.l.b16 %v32_v0 }
   0x3   :  { %12 = vsyncpa [#allocation3], 0  ;;  %vm46_vm0 = vcmask 1041408   ;;  %116 = vmatpush.bf16.msra.mxu1 %v228_v2  ;;  %v224_v5 = vld [vmem:[%s340_s1] sm:$0xff]  ;;  %vm42_vm1 = vcmask 162816   ;;  %v227_v8 = vld [vmem:[%s342_s3 + $0x10] sm:$0xff] }
   0x4   :  { %v40_v3 = vpack.c.b16 %v38_v1, %v38_v1  ;;  %v28_v6 = vld [vmem:[%s339_s0] sm:$0xff]  ;;  %v226_v9 = vld [vmem:[%s342_s3 + $0x8] sm:$0xff]  ;;  %vm108_vm2 = vcmask 523264   ;;  %vm158_vm3 = vcmask 261120   ;;  %s184_s23 = sshll.u32 %s346_s7, 4  ;;  %vm175_vm4 = vcmask 130048   ;;  %s185_s23 = int_to_ptr.hbm [resolvable:$true] %s184_s23 }
   0x5   :  { %v29_v7 = vpack.c.bf16 %v28_v6, %v28_v6  ;;  %v225_v10 = vld [vmem:[%s342_s3] sm:$0xff]  ;;  %v230_v22 = vld [vmem:[%s344_s5 + $0x8] sm:$0xff] }
   0x6   :  { %v48_v4 = vsel %vm46_vm0, %v40_v3, 0  ;;  %v64_v11 = vld [vmem:[%s341_s2] sm:$0x1]  ;;  %168 = vmatpush.bf16.msra.mxu2 %v230_v22 }
   0x7   :  { %56 = vmatpush.bf16.msra.mxu0 %v48_v4  ;;  %117 = vmatpush.bf16.msra.mxu1 %v227_v8  ;;  %v66_v12 = vpack.i.b16 %v64_v11, %v64_v11  ;;  %v229_v23 = vld [vmem:[%s344_s5] sm:$0xff]  ;;  %s259_s5 = smov [#allocation2]  }
   0x8   :  { %v126_v24 = vld [vmem:[%s343_s4] sm:$0x1]  ;;  %s182_s21 = sshll.u32 %s259_s5, 4  ;;  %s183_s21 = int_to_ptr.vmem [resolvable:$true] %s182_s21 }
   0x9   :  { %v68_v13 = vperm.slane %v66_v12, 0  ;;  %v128_v25 = vpack.i.b16 %v126_v24, %v126_v24  ;;  %v232_v35 = vld [vmem:[%s345_s6] ss:$0 sm:$0xff] }
   0xa   :  { %169 = vmatpush.bf16.msra.mxu2 %v229_v23 }
   0xb   :  { %57 = vmatpush.bf16.msra.mxu0 %v224_v5  ;;  %118 = vmatpush.bf16.msra.mxu1 %v226_v9  ;;  %v70_v16 = vunpack.c.l.bf16 %v68_v13  ;;  %v130_v26 = vperm.slane %v128_v25, 0 }
   0xd   :  { %v132_v29 = vunpack.c.l.bf16 %v130_v26 }
   0xe   :  { %197 = vmatmul.msk.bf16.vlgmr.msra.gmra.mxu0 %vm42_vm1, %v29_v7 }
   0xf   :  { %119 = vmatpush.bf16.msra.mxu1 %v225_v10 }
  0x8b   :  { %v59_v14 = vpop.f32.mrf.mxu0 }
  0x8c   :  { %v63_v15 = vpack.c.bf16 %v59_v14, %v59_v14 }
  0x8e   :  { %v69_v17 = vunpack.c.l.bf16 %v63_v15 }
  0x90   :  { %v71_v18 = vadd.f32 %v70_v16, %v69_v17 }
  0x92   :  { %v74_v19 = vmax.f32 %v71_v18, 0.0 }
  0x93   :  { %v61_v20 = vpop.f32.mrf.mxu0 }
  0x94   :  { %v75_v21 = vpack.c.bf16 %v74_v19, %v74_v19 }
  0x96   :  { %214 = vmatmul.msk.bf16.vlgmr.msra.gmra.mxu1 %vm108_vm2, %v75_v21 }
 0x113   :  { %v121_v27 = vpop.f32.mrf.mxu1 }
 0x114   :  { %v125_v28 = vpack.c.bf16 %v121_v27, %v121_v27 }
 0x116   :  { %v131_v30 = vunpack.c.l.bf16 %v125_v28 }
 0x118   :  { %v133_v31 = vadd.f32 %v132_v29, %v131_v30 }
 0x11a   :  { %v136_v32 = vmax.f32 %v133_v31, 0.0 }
 0x11b   :  { %v123_v33 = vpop.f32.mrf.mxu1 }
 0x11c   :  { %v137_v34 = vpack.c.bf16 %v136_v32, %v136_v32 }
 0x11e   :  { %223 = vmatmul.msk.bf16.vlgmr.msra.gmra.mxu2 %vm158_vm3, %v137_v34 }
 0x1a1   :  { %v171_v36 = vpop.f32.mrf.mxu2 }
 0x1a2   :  { %v172_v37 = vadd.f32 %v232_v35, %v171_v36 }
 0x1a4   :  { %176 = vst.msk [vmem:[#allocation2] sm:$0xff] %vm175_vm4, %v172_v37 }
 0x1a5   :  { %187 = dma.vmem_to_hbm [thread:$0]  %s183_s21, 128, %s185_s23, [#allocation3]  }
 0x1a9   :  { %v173_v38 = vpop.f32.mrf.mxu2 }
 0x1aa   :  { %257 = dma.done.wait [#allocation3], 128  }
 0x1ab   :  { %258 = vsyncadd [#allocation3], 4294967168 }
 0x1ac   :  { %192 = vsyncpa [#allocation3], 1 }

</bundles_post_ra>
